<compile_context>
chip_gen: v5e
topology: v5e:2x2
jax: 0.10.0
libtpu: 0.0.40
codegen_flags: <defaults>
</compile_context>

<pallas_src>
import jax
import jax.numpy as jnp
from jax.experimental import pallas as pl
from jax.experimental.pallas import tpu as pltpu


def _round_up(x, m):
    return ((x + m - 1) // m) * m


def _cdiv(a, b):
    return (a + b - 1) // b


# --------------------------------------------------------------------------
# Kernels
# --------------------------------------------------------------------------

def _mlp_kernel_resident(x_ref, w1_ref, b1_ref, w2_ref, b2_ref, o_ref):
    """Whole hidden dim resident in VMEM: one fused pass, no accumulator."""
    h = jnp.dot(x_ref[...], w1_ref[...], preferred_element_type=jnp.float32)
    h = jnp.maximum(h + b1_ref[...], 0.0)
    out = jnp.dot(h.astype(w2_ref.dtype), w2_ref[...],
                  preferred_element_type=jnp.float32) + b2_ref[...]
    o_ref[...] = out.astype(o_ref.dtype)


def _mlp_kernel_ktiled(x_ref, w1_ref, b1_ref, w2_ref, b2_ref, o_ref, acc_ref):
    """One (row-block, K-block) step with an f32 accumulator in VMEM."""
    k = pl.program_id(1)

    @pl.when(k == 0)
    def _():
        acc_ref[...] = jnp.zeros_like(acc_ref)

    h = jnp.dot(x_ref[...], w1_ref[...], preferred_element_type=jnp.float32)
    h = jnp.maximum(h + b1_ref[...], 0.0)
    acc_ref[...] += jnp.dot(h.astype(w2_ref.dtype), w2_ref[...],
                            preferred_element_type=jnp.float32)

    @pl.when(k == pl.num_programs(1) - 1)
    def _():
        o_ref[...] = (acc_ref[...] + b2_ref[...]).astype(o_ref.dtype)


# --------------------------------------------------------------------------
# Host-side helpers
# --------------------------------------------------------------------------

def _vmem_budget_bytes(frac=0.80):
    """~80% of per-core VMEM (leaves headroom for compiler internal scratch)."""
    cap = 64 * 1024 * 1024  # conservative default = v7x per-TC VMEM
    try:
        info = pltpu.get_tpu_info()
        cap = int(getattr(info, "vmem_capacity_bytes", cap))
    except Exception:
        pass
    return int(cap * frac)


def pad_mlp_params(w1, b1, w2, b2, compute_dtype=None):
    """Zero-pad params to lane-aligned shapes ONCE (hoisted out of forward).

    Zero-padded hidden columns are inert: b1 pad is 0 so relu(0)=0 feeds zero
    W2 rows; zero-padded output columns are sliced off after the kernel.
    """
    in_feats, n_units = w1.shape
    n_units2, out_feats = w2.shape
    assert n_units == n_units2, "w1/w2 hidden dims mismatch"
    cdt = compute_dtype if compute_dtype is not None else w1.dtype

    in_p = _round_up(in_feats, 128)
    hid_p = _round_up(n_units, 128)
    out_p = _round_up(out_feats, 128)

    b1 = jnp.asarray(b1).reshape(1, -1)
    b2 = jnp.asarray(b2).reshape(1, -1)

    w1p = jnp.zeros((in_p, hid_p), cdt).at[:in_feats, :n_units].set(w1.astype(cdt))
    b1p = jnp.zeros((1, hid_p), jnp.float32).at[:, :n_units].set(b1.astype(jnp.float32))
    w2p = jnp.zeros((hid_p, out_p), cdt).at[:n_units, :out_feats].set(w2.astype(cdt))
    b2p = jnp.zeros((1, out_p), jnp.float32).at[:, :out_feats].set(b2.astype(jnp.float32))

    return dict(w1=w1p, b1=b1p, w2=w2p, b2=b2p,
                in_feats=in_feats, n_units=n_units, out_feats=out_feats,
                compute_dtype=cdt)


def _auto_tiles(N, in_p, hid_p, out_p, isz, osz, row_align, budget):
    """Pick (tm, tk). tk == hid_p means the weights are fully VMEM-resident."""
    N_min_pad = _round_up(max(N, 1), row_align)
    tm_cap = N_min_pad
    if N_min_pad >= 2 * row_align:
        # >=2 row blocks: megacore sharding (v7x) + DMA/compute overlap.
        tm_cap = _round_up(_cdiv(N_min_pad, 2), row_align)

    bias_bytes = 2 * 8 * (hid_p + out_p) * 4       # (1,n) pads to 8 sublanes
    per_row = 2 * in_p * isz + 2 * out_p * osz     # x / out double-buffers

    # --- Path A: weights resident (fetched from HBM exactly once). ---
    # Count weights at 2x as a safety margin against buffer duplication.
    avail = budget - 2 * (in_p * hid_p + hid_p * out_p) * isz - bias_bytes
    if avail >= per_row * row_align:
        tm = min((avail // per_row) // row_align * row_align, 512, tm_cap)
        return max(tm, row_align), hid_p

    # --- Path B: K-tiled. Weight HBM traffic ~ 1/tm, so maximize tm first;
    # then pick the largest tk that fits, shrunk to the smallest multiple of
    # 128 that keeps the same K-step count (minimal hidden-dim padding). ---
    for tm in (1024, 512, 384, 256, 192, 128, 96, 64, 48, 32, 24, 16, 8):
        if tm % row_align or tm > tm_cap:
            continue
        rem = (budget - 2 * tm * in_p * isz - 2 * tm * out_p * osz
               - tm * out_p * 4 - bias_bytes)
        per_tk = 2 * (in_p + out_p) * isz
        if rem < per_tk * 128:
            continue
        tk_max = min((rem // per_tk) // 128 * 128, hid_p)
        n_k = _cdiv(hid_p, tk_max)
        return tm, _round_up(_cdiv(hid_p, n_k), 128)

    return row_align, 128  # last resort for extremely small budgets


def mlp_forward(x, params, *, tm=None, tk=None, vmem_budget_bytes=None):
    """out = relu(x @ W1 + b1) @ W2 + b2 with pre-padded params (fused kernel)."""
    w1p, b1p, w2p, b2p = params["w1"], params["b1"], params["w2"], params["b2"]
    in_feats = params["in_feats"]
    out_feats = params["out_feats"]
    cdt = params["compute_dtype"]

    N, in_x = x.shape
    assert in_x == in_feats, "x feature dim mismatch"
    out_dtype = x.dtype

    in_p, hid_p = w1p.shape
    out_p = w2p.shape[1]
    isz = jnp.dtype(cdt).itemsize
    osz = jnp.dtype(out_dtype).itemsize
    # bf16 packs 16 rows per sublane group; f32 packs 8.
    row_align = 16 if isz == 2 else 8

    budget = int(vmem_budget_bytes) if vmem_budget_bytes else _vmem_budget_bytes()

    tm_auto, tk_auto = _auto_tiles(N, in_p, hid_p, out_p, isz, osz,
                                   row_align, budget)
    tm = tm_auto if tm is None else max(row_align, _round_up(tm, row_align))
    tk = tk_auto if tk is None else min(_round_up(tk, 128), hid_p)
    resident = tk >= hid_p

    N_p = _round_up(N, tm)
    hid_pp = _round_up(hid_p, tk)  # extra hidden padding only if tk !| hid_p

    # x padding (weights were padded once in pad_mlp_params).
    if x.shape == (N_p, in_p) and x.dtype == cdt:
        xp = x
    else:
        xp = jnp.zeros((N_p, in_p), cdt).at[:N, :in_feats].set(x.astype(cdt))

    if hid_pp != hid_p:
        # K-tiled fallback only: pad hidden so tk divides (zeros are inert).
        w1p = jnp.zeros((in_p, hid_pp), cdt).at[:, :hid_p].set(w1p)
        b1p = jnp.zeros((1, hid_pp), jnp.float32).at[:, :hid_p].set(b1p)
        w2p = jnp.zeros((hid_pp, out_p), cdt).at[:hid_p, :].set(w2p)

    if resident:
        grid = (N_p // tm,)
        in_specs = [
            pl.BlockSpec((tm, in_p), lambda i: (i, 0)),        # x row tile
            pl.BlockSpec((in_p, hid_pp), lambda i: (0, 0)),    # W1 (resident)
            pl.BlockSpec((1, hid_pp), lambda i: (0, 0)),       # b1 (resident)
            pl.BlockSpec((hid_pp, out_p), lambda i: (0, 0)),   # W2 (resident)
            pl.BlockSpec((1, out_p), lambda i: (0, 0)),        # b2 (resident)
        ]
        out_spec = pl.BlockSpec((tm, out_p), lambda i: (i, 0))
        scratch = []
        kernel = _mlp_kernel_resident
        dim_sem = ("parallel",)
    else:
        grid = (N_p // tm, hid_pp // tk)  # reduction (K) axis last
        in_specs = [
            pl.BlockSpec((tm, in_p), lambda i, k: (i, 0)),     # x row tile
            pl.BlockSpec((in_p, tk), lambda i, k: (0, k)),     # W1 K-slice
            pl.BlockSpec((1, tk), lambda i, k: (0, k)),        # b1 K-slice
            pl.BlockSpec((tk, out_p), lambda i, k: (k, 0)),    # W2 K-slice
            pl.BlockSpec((1, out_p), lambda i, k: (0, 0)),     # b2
        ]
        out_spec = pl.BlockSpec((tm, out_p), lambda i, k: (i, 0))
        scratch = [pltpu.VMEM((tm, out_p), jnp.float32)]
        kernel = _mlp_kernel_ktiled
        dim_sem = ("parallel", "arbitrary")

    out_padded = pl.pallas_call(
        kernel,
        out_shape=jax.ShapeDtypeStruct((N_p, out_p), out_dtype),
        grid_spec=pltpu.PrefetchScalarGridSpec(
            num_scalar_prefetch=0,
            grid=grid,
            in_specs=in_specs,
            out_specs=out_spec,
            scratch_shapes=scratch,
        ),
        compiler_params=pltpu.CompilerParams(
            dimension_semantics=dim_sem,
            vmem_limit_bytes=int(budget),
        ),
    )(xp, w1p, b1p, w2p, b2p)

    return out_padded[:N, :out_feats]


def mlp_apply(x, w1, b1, w2, b2, *, compute_dtype=None, **kw):
    """Convenience wrapper: pads params then runs forward (prefer hoisting)."""
    params = pad_mlp_params(w1, b1, w2, b2, compute_dtype=compute_dtype)
    return mlp_forward(x, params, **kw)


def init_params(key, in_feats, n_units, out_feats, dtype=jnp.float32):
    # Deterministic init mimicking nn.Linear default (uniform +/- 1/sqrt(fan_in)).
    k1, k2, k3, k4 = jax.random.split(key, 4)
    lim1 = 1.0 / jnp.sqrt(in_feats)
    lim2 = 1.0 / jnp.sqrt(n_units)
    w1 = jax.random.uniform(k1, (in_feats, n_units), dtype, -lim1, lim1)
    b1 = jax.random.uniform(k2, (1, n_units), dtype, -lim1, lim1)
    w2 = jax.random.uniform(k3, (n_units, out_feats), dtype, -lim2, lim2)
    b2 = jax.random.uniform(k4, (1, out_feats), dtype, -lim2, lim2)
    return w1, b1, w2, b2


if __name__ == "__main__":
    # Small shapes consistent with the module: exercises row tiling, lane
    # padding (64->128, 192->256, 10->128), the resident-weights fast path,
    # the K-tiled fallback, and the bf16 MXU path.
    N, in_feats, n_units, out_feats = 48, 64, 192, 10

    key = jax.random.PRNGKey(0)
    kx, kp = jax.random.split(key)
    x = jax.random.normal(kx, (N, in_feats), jnp.float32)
    w1, b1, w2, b2 = init_params(kp, in_feats, n_units, out_feats)

    # Reference in plain JAX (same math as the PyTorch forward).
    ref = jnp.maximum(x @ w1 + b1, 0.0) @ w2 + b2

    # 1) Auto tiling: weights VMEM-resident (K grid collapses), f32 strict.
    params_f32 = pad_mlp_params(w1, b1, w2, b2)            # pad once (hoisted)
    out = jax.block_until_ready(mlp_forward(x, params_f32))
    assert out.shape == (N, out_feats)
    assert jnp.allclose(out, ref, atol=1e-4, rtol=1e-4), "resident f32 mismatch"

    # 2) Forced K-tiling (tk < padded hidden dim): accumulator path, f32 strict.
    out_kt = jax.block_until_ready(mlp_forward(x, params_f32, tm=16, tk=128))
    assert out_kt.shape == (N, out_feats)
    assert jnp.allclose(out_kt, ref, atol=1e-4, rtol=1e-4), "K-tiled f32 mismatch"

    # 3) bf16 MXU path (f32 accumulation / epilogue) — looser tolerance by design.
    params_bf16 = pad_mlp_params(w1, b1, w2, b2, compute_dtype=jnp.bfloat16)
    out_bf = jax.block_until_ready(mlp_forward(x, params_bf16))
    assert out_bf.shape == (N, out_feats)
    assert jnp.allclose(out_bf, ref, atol=5e-2, rtol=5e-2), "bf16 path mismatch"

    print("KERNEL_OK")
</pallas_src>

<mosaic_0001>
module attributes {stable_mosaic.version = 11 : i64} {
  func.func @_mlp_kernel_resident(%arg0: i32, %arg1: memref<24x128xf32, #tpu.memory_space<vmem>>, %arg2: memref<128x256xf32, #tpu.memory_space<vmem>>, %arg3: memref<1x256xf32, #tpu.memory_space<vmem>>, %arg4: memref<256x128xf32, #tpu.memory_space<vmem>>, %arg5: memref<1x128xf32, #tpu.memory_space<vmem>>, %arg6: memref<24x128xf32, #tpu.memory_space<vmem>>) attributes {dimension_semantics = [#tpu.dimension_semantics<parallel>], iteration_bounds = array<i64: 2>, scalar_prefetch = 0 : i64, scratch_operands = 0 : i64, tpu.core_type = #tpu.core_type<tc>, window_params = [{transform_indices = @transform_0, window_bounds = array<i64: 24, 128>}, {pipeline_mode = #tpu.pipeline_mode<synchronous>, transform_indices = @transform_1, window_bounds = array<i64: 128, 256>}, {pipeline_mode = #tpu.pipeline_mode<synchronous>, transform_indices = @transform_2, window_bounds = array<i64: 1, 256>}, {pipeline_mode = #tpu.pipeline_mode<synchronous>, transform_indices = @transform_3, window_bounds = array<i64: 256, 128>}, {pipeline_mode = #tpu.pipeline_mode<synchronous>, transform_indices = @transform_4, window_bounds = array<i64: 1, 128>}, {transform_indices = @transform_5, window_bounds = array<i64: 24, 128>}]} {
    %c0 = arith.constant 0 : index
    %c0_0 = arith.constant 0 : index
    %0 = vector.load %arg1[%c0, %c0_0] : memref<24x128xf32, #tpu.memory_space<vmem>>, vector<24x128xf32>
    %c0_1 = arith.constant 0 : index
    %c0_2 = arith.constant 0 : index
    %1 = vector.load %arg2[%c0_1, %c0_2] : memref<128x256xf32, #tpu.memory_space<vmem>>, vector<128x256xf32>
    %cst = arith.constant dense<0.000000e+00> : vector<24x256xf32>
    %2 = tpu.matmul %0, %1, %cst {dimension_numbers = #tpu.dot_dimension_numbers<[1], [0], [0], [1], [0, 0, 1, 1], [], []>} : vector<24x128xf32>, vector<128x256xf32>, vector<24x256xf32> -> vector<24x256xf32>
    %c0_3 = arith.constant 0 : index
    %c0_4 = arith.constant 0 : index
    %3 = vector.load %arg3[%c0_3, %c0_4] : memref<1x256xf32, #tpu.memory_space<vmem>>, vector<1x256xf32>
    %4 = vector.broadcast %3 : vector<1x256xf32> to vector<24x256xf32>
    %5 = arith.addf %2, %4 : vector<24x256xf32>
    %cst_5 = arith.constant 0.000000e+00 : f32
    %6 = vector.broadcast %cst_5 : f32 to vector<24x256xf32>
    %7 = arith.maximumf %5, %6 : vector<24x256xf32>
    %c0_6 = arith.constant 0 : index
    %c0_7 = arith.constant 0 : index
    %8 = vector.load %arg4[%c0_6, %c0_7] : memref<256x128xf32, #tpu.memory_space<vmem>>, vector<256x128xf32>
    %cst_8 = arith.constant dense<0.000000e+00> : vector<24x128xf32>
    %9 = tpu.matmul %7, %8, %cst_8 {dimension_numbers = #tpu.dot_dimension_numbers<[1], [0], [0], [1], [0, 0, 1, 1], [], []>} : vector<24x256xf32>, vector<256x128xf32>, vector<24x128xf32> -> vector<24x128xf32>
    %c0_9 = arith.constant 0 : index
    %c0_10 = arith.constant 0 : index
    %10 = vector.load %arg5[%c0_9, %c0_10] : memref<1x128xf32, #tpu.memory_space<vmem>>, vector<1x128xf32>
    %11 = vector.broadcast %10 : vector<1x128xf32> to vector<24x128xf32>
    %12 = arith.addf %9, %11 : vector<24x128xf32>
    %c0_11 = arith.constant 0 : index
    %c0_12 = arith.constant 0 : index
    %13 = vector.load %arg6[%c0_11, %c0_12] : memref<24x128xf32, #tpu.memory_space<vmem>>, vector<24x128xf32>
    tpu.vector_store %arg6[%c0_11, %c0_12], %12 {strides = array<i32>} : memref<24x128xf32, #tpu.memory_space<vmem>>, vector<24x128xf32>,
    return
  }
  func.func @transform_0(%arg0: i32) -> (i32, i32) {
    %c0_i32 = arith.constant 0 : i32
    %c0_i32_0 = arith.constant 0 : i32
    return %arg0, %c0_i32 : i32, i32
  }
  func.func @transform_1(%arg0: i32) -> (i32, i32) {
    %c0_i32 = arith.constant 0 : i32
    %c0_i32_0 = arith.constant 0 : i32
    %c0_i32_1 = arith.constant 0 : i32
    return %c0_i32, %c0_i32_0 : i32, i32
  }
  func.func @transform_2(%arg0: i32) -> (i32, i32) {
    %c0_i32 = arith.constant 0 : i32
    %c0_i32_0 = arith.constant 0 : i32
    %c0_i32_1 = arith.constant 0 : i32
    return %c0_i32, %c0_i32_0 : i32, i32
  }
  func.func @transform_3(%arg0: i32) -> (i32, i32) {
    %c0_i32 = arith.constant 0 : i32
    %c0_i32_0 = arith.constant 0 : i32
    %c0_i32_1 = arith.constant 0 : i32
    return %c0_i32, %c0_i32_0 : i32, i32
  }
  func.func @transform_4(%arg0: i32) -> (i32, i32) {
    %c0_i32 = arith.constant 0 : i32
    %c0_i32_0 = arith.constant 0 : i32
    %c0_i32_1 = arith.constant 0 : i32
    return %c0_i32, %c0_i32_0 : i32, i32
  }
  func.func @transform_5(%arg0: i32) -> (i32, i32) {
    %c0_i32 = arith.constant 0 : i32
    %c0_i32_0 = arith.constant 0 : i32
    return %arg0, %c0_i32 : i32, i32
  }
}

</mosaic_0001>

<bundles_post_ra>
// kernel: tpu_custom_call.1
= control target key start
LH: loop header
LB: loop body
LE: loop exit
PB: predicated region body
PF: predicated region fallthrough
CT: control target
= control target key end

     0   :  { %s1116_s0 = inlined_call_operand.hbm [shape: f32[48,128], index: 0, kind: input, shape index: {}]   ;;  %s1117_s1 = inlined_call_operand.hbm [shape: f32[128,256], index: 1, kind: input, shape index: {}]   ;;  %s1118_s2 = inlined_call_operand.hbm [shape: f32[1,256], index: 2, kind: input, shape index: {}]   ;;  %s1119_s3 = inlined_call_operand.hbm [shape: f32[256,128], index: 3, kind: input, shape index: {}]   ;;  %s1120_s4 = inlined_call_operand.vmem [shape: f32[1,128], index: 4, kind: input, shape index: {}]   ;;  %s1121_s5 = inlined_call_operand.hbm [shape: f32[48,128], index: 5, kind: output, shape index: {}]  }
   0x1   :  { %1124 = sst [smem:[#allocation15_spill]] %s1117_s1 }
   0x2   :  { %10 = vsyncpa [#allocation3], 0 }
   0x3   :  { %12 = vsyncpa [#allocation3 + $0x1], 0 }
   0x4   :  { %13 = vsyncpa [#allocation6], 0 }
   0x5   :  { %14 = vsyncpa [#allocation9], 0 }
   0x6   :  { %15 = vsyncpa [#allocation4], 0 }
   0x7   :  { %17 = vsyncpa [#allocation4 + $0x1], 0  ;;  %s940_s18 = smov 0   ;;  %s942_s19 = smov 0  }
   0x8   :  { %s944_s20 = smov 0   ;;  %s946_s21 = smov 0  }
   0x9 LB: > { %s961_s22 = sadd.s32 4294967295, %s899_s21   ;;  %s603_s23 = sadd.s32 4294967294, %s899_s21   ;;  %s899_s21 = sphi %s946_s21, %s1138_s21   ;;  %s895_s20 = sphi %s944_s20, %s1137_s20   ;;  %s891_s19 = sphi %s942_s19, %s1136_s19   ;;  %s887_s18 = sphi %s940_s18, %s1135_s18  }
   0xa   : > { %p43_p0 = scmp.ne.s32.totalorder %s891_s19, %s887_s18  ;;  %p44_p1 = scmp.eq.s32.totalorder %s961_s22, 0 }
   0xb   : > { %p151_p2 = scmp.eq.s32.totalorder %s961_s22, 1  ;;  %p157_p3 = scmp.eq.s32.totalorder %s603_s23, 1 }
   0xc   : > { %p970_p4 = por %p44_p1, %p43_p0  ;;  %p604_p5 = scmp.ge.s32.totalorder %s899_s21, 1 }
   0xd   : > { %p975_p6 = por %p157_p3, %p43_p0  ;;  %p164_p7 = scmp.lt.s32.totalorder %s899_s21, 3 }
   0xe   : > { %s1127_s1 = sld [smem:[#allocation15_spill]]  ;;  %s901_s30 = smov [#allocation5]  }
   0xf   : > { %p983_p8 = pnand %p604_p5, %p164_p7  ;;  %s177_s6 = sshll.u32 %s901_s30, 4  ;;  %s178_s6 = int_to_ptr.vmem [resolvable:$true] %s177_s6 }
  0x10   : > { %s190_s10 = sshll.u32 %s1118_s2, 4  ;;  %s902_s11 = smov 256   ;;  %s191_s10 = int_to_ptr.hbm [resolvable:$true] %s190_s10 }
  0x11   : > { %p637_p9 = pneg %p983_p8  ;;  %s903_s12 = smov 16  }
  0x12   : > { %s904_s13 = smov [#allocation7]   ;;  %s201_s17 = sshll.u32 %s1119_s3, 4  ;;  %s202_s17 = int_to_ptr.hbm [resolvable:$true] %s201_s17 }
  0x13   : > { %p991_p10 = pnand %p637_p9, %p44_p1  ;;  %s192_s14 = sshll.u32 %s904_s13, 4  ;;  %s193_s14 = int_to_ptr.vmem [resolvable:$true] %s192_s14 }
  0x14   : > { %s175_s28 = sshll.u32 %s1127_s1, 4  ;;  %s905_s23 = smov [#allocation8]   ;;  %s176_s28 = int_to_ptr.hbm [resolvable:$true] %s175_s28 }
  0x15   : > { %640 = dma.hbm_to_vmem [thread:$0]  (!%p991_p10), %s176_s28, 4096, %s178_s6, [#allocation6], %s902_s11, %s902_s11, %s903_s12  }
  0x16   : > { %643 = dma.hbm_to_vmem [thread:$0]  (!%p991_p10), %s191_s10, 32, %s193_s14, [#allocation6]  }
  0x17   : > { %s203_s26 = sshll.u32 %s905_s23, 4  ;;  %s1122_s27 = smov 128   ;;  %s204_s26 = int_to_ptr.vmem [resolvable:$true] %s203_s26 }
  0x18   : > { %s1123_s28 = smov 8   ;;  %s1012_s30 = sadd.s32 1, %s899_s21  }
  0x19   : > { %646 = dma.hbm_to_vmem [thread:$0]  (!%p991_p10), %s202_s17, 4096, %s204_s26, [#allocation9], %s1122_s27, %s1122_s27, %s1123_s28  }
  0x1a   : > { %s27_s6 = ssub.s32 %s899_s21, %s1012_s30  ;;  %s30_s8 = sadd.s32 1, %s895_s20 }
  0x1b   : > { %p28_p12 = scmp.eq.s32.totalorder %s27_s6, 0  ;;  %p37_p13 = scmp.ne.s32.totalorder %s895_s20, %s891_s19 }
  0x1c   : > { %p38_p0 = scmp.eq.s32.totalorder %s899_s21, 0  ;;  %p658_p3 = scmp.lt.s32.totalorder %s899_s21, 2 }
  0x1d   : > { %s1022_s9 = scalar_select %p28_p12, %s895_s20, %s30_s8  }
  0x1e   : > { %p39_p5 = por %p38_p0, %p37_p13  ;;  %p1026_p7 = por %p151_p2, %p37_p13 }
  0x1f   : > { %s220_s7 = sand.u32 1, %s895_s20   ;;  %s617_s11 = smul.u32 24, %s899_s21 }
  0x20   : > { %s619_s12 = smul.u32 24, %s220_s7  ;;  %p1035_p9 = pnand %p658_p3, %p39_p5 }
  0x21   : > { %s229_s15 = scalar_lea.hbm %s1116_s0, %s617_s11  ;;  %s221_s6 = scalar_lea.sflag [#allocation3], %s220_s7 }
  0x22   : > { %s230_s17 = sshll.u32 %s229_s15, 4  ;;  %s224_s23 = scalar_lea.vmem [#allocation2], %s619_s12  ;;  %s231_s17 = int_to_ptr.hbm [resolvable:$true] %s230_s17 }
  0x23   : > { %s232_s26 = sshll.u32 %s224_s23, 4  ;;  %s795_s8 = sshra.s32 %s231_s17, 4  ;;  %s233_s26 = int_to_ptr.vmem [resolvable:$true] %s232_s26  ;;  %s796_s8 = int_to_ptr.hbm [resolvable:$true] %s795_s8 }
  0x24   : > { %s797_s27 = scalar_lea.hbm %s796_s8, 24  ;;  %p799_p10 = pneg %p1035_p9 }
  0x25   : > { %p798_p2 = scmp.ne.s32.totalorder %s796_s8, %s797_s27  ;;  %s802_s14 = scalar_lea.hbm %s1116_s0, 48 }
  0x26   : > { %p803_p0 = scmp.lt.s32.totalorder %s796_s8, %s1116_s0  ;;  %p804_p3 = scmp.lt.s32.totalorder %s802_s14, %s797_s27 }
  0x27   : > { %p800_p12 = pnand %p799_p10, %p798_p2 }
  0x28   : > { %p805_p5 = por %p804_p3, %p803_p0 }
  0x29   : > { %p801_p13 = pneg %p800_p12 }
  0x2b   : > { %p806_p11 = pnand %p805_p5, %p801_p13 }
  0x2d   : > { %809 = shalt.err (!%p806_p11)
}
  0x2e   : > { %s1132_s7 = smov 8   ;;  %s1133_s12 = smov 128  }
  0x2f   : > { %650 = dma.hbm_to_vmem [thread:$0]  (!%p1035_p9), %s231_s17, 384, %s233_s26, %s221_s6, %s1133_s12, %s1133_s12, %s1132_s7  }
  0x30   : > { %244 = sbr.rel (%p983_p8) target bundleno = 376 (0x178), region = 40  ;;  %s1055_s15 = sand.u32 (!%p983_p8), 1, %s891_s19  }
  0x31   : > { %s620_s1 = smul.u32 (!%p983_p8), 24, %s1055_s15  ;;  %s247_s27 = scalar_lea.sflag (!%p983_p8), [#allocation3], %s1055_s15 }
  0x33   : > { %s1061_s28 = scalar_lea.vmem (!%p983_p8), [#allocation2], %s620_s1 }
  0x35   : > { %870 = dma.done.wait (%p970_p4), %s247_s27, 384  }
  0x36   : > { %872 = vsyncadd (%p970_p4), %s247_s27, 4294966912 }
  0x37   : > { %874 = dma.done.wait (%p44_p1), [#allocation6], 4128  }
  0x38   : > { %876 = vsyncadd (%p44_p1), [#allocation6], 4294963168 }
  0x39   : > { %878 = dma.done.wait (%p44_p1), [#allocation9], 4096  }
  0x3a   : > { %880 = vsyncadd (%p44_p1), [#allocation9], 4294963200  ;;  %v328_v0 = vld [vmem:[#allocation5 + $0xf0] sm:$0xff]  ;;  %v326_v1 = vld [vmem:[#allocation5 + $0xe0] sm:$0xff]  ;;  %s292_s16 = scalar_lea.vmem [#allocation10], %s620_s1  ;;  %s618_s17 = smul.u32 24, %s961_s22 }
  0x3b   : > { %v329_v2 = vld [vmem:[#allocation5 + $0xf8] sm:$0xff]  ;;  %336 = vmatpush.msra.mxu0 %v328_v0  ;;  %v327_v3 = vld [vmem:[#allocation5 + $0xe8] sm:$0xff]  ;;  %v324_v4 = vld [vmem:[#allocation5 + $0xd0] sm:$0xff]  ;;  %s498_s8 = sshll.u32 %s292_s16, 4  ;;  %s486_s13 = scalar_lea.sflag [#allocation4], %s1055_s15  ;;  %s499_s8 = int_to_ptr.vmem [resolvable:$true] %s498_s8 }
  0x3c   : > { %362 = vmatpush.msra.mxu1 %v329_v2  ;;  %v325_v5 = vld [vmem:[#allocation5 + $0xd8] sm:$0xff]  ;;  %v322_v6 = vld [vmem:[#allocation5 + $0xc0] sm:$0xff]  ;;  %v323_v7 = vld [vmem:[#allocation5 + $0xc8] sm:$0xff]  ;;  %s497_s6 = scalar_lea.hbm %s1121_s5, %s618_s17  ;;  %s845_s1 = scalar_lea.hbm %s1121_s5, 48 }
  0x3d   : > { %337 = vmatpush.msra.mxu0 %v326_v1  ;;  %v320_v8 = vld [vmem:[#allocation5 + $0xb0] sm:$0xff]  ;;  %v321_v9 = vld [vmem:[#allocation5 + $0xb8] sm:$0xff]  ;;  %v318_v10 = vld [vmem:[#allocation5 + $0xa0] sm:$0xff]  ;;  %s500_s11 = sshll.u32 %s497_s6, 4  ;;  %s501_s11 = int_to_ptr.hbm [resolvable:$true] %s500_s11 }
  0x3e   : > { %363 = vmatpush.msra.mxu1 %v327_v3  ;;  %v319_v11 = vld [vmem:[#allocation5 + $0xa8] sm:$0xff]  ;;  %v316_v12 = vld [vmem:[#allocation5 + $0x90] sm:$0xff]  ;;  %v317_v13 = vld [vmem:[#allocation5 + $0x98] sm:$0xff]  ;;  %s839_s14 = sshra.s32 %s501_s11, 4  ;;  %s840_s14 = int_to_ptr.hbm [resolvable:$true] %s839_s14 }
  0x3f   : > { %338 = vmatpush.msra.mxu0 %v324_v4  ;;  %v314_v14 = vld [vmem:[#allocation5 + $0x80] sm:$0xff]  ;;  %v315_v15 = vld [vmem:[#allocation5 + $0x88] sm:$0xff]  ;;  %v312_v16 = vld [vmem:[#allocation5 + $0x70] sm:$0xff]  ;;  %s841_s22 = scalar_lea.hbm %s840_s14, 24  ;;  %p846_p11 = scmp.lt.s32.totalorder %s840_s14, %s1121_s5 }
  0x40   : > { %364 = vmatpush.msra.mxu1 %v325_v5  ;;  %v313_v17 = vld [vmem:[#allocation5 + $0x78] sm:$0xff]  ;;  %v310_v18 = vld [vmem:[#allocation5 + $0x60] sm:$0xff]  ;;  %v311_v19 = vld [vmem:[#allocation5 + $0x68] sm:$0xff]  ;;  %p842_p1 = scmp.ne.s32.totalorder %s840_s14, %s841_s22  ;;  %p847_p9 = scmp.lt.s32.totalorder %s845_s1, %s841_s22 }
  0x41   : > { %339 = vmatpush.msra.mxu0 %v322_v6  ;;  %v409_v20 = vld [vmem:[#allocation8 + $0x78] sm:$0xff]  ;;  %v408_v22 = vld [vmem:[#allocation8 + $0x70] sm:$0xff]  ;;  %v407_v26 = vld [vmem:[#allocation8 + $0x68] sm:$0xff] }
  0x42   : > { %365 = vmatpush.msra.mxu1 %v323_v7  ;;  %v425_v21 = vld [vmem:[#allocation8 + $0xf8] sm:$0xff]  ;;  %v424_v23 = vld [vmem:[#allocation8 + $0xf0] sm:$0xff]  ;;  %430 = vmatpush.msra.mxu2 %v409_v20  ;;  %v423_v27 = vld [vmem:[#allocation8 + $0xe8] sm:$0xff]  ;;  %p843_p4 = pnand %p842_p1, %p1026_p7  ;;  %p848_p2 = por %p847_p9, %p846_p11 }
  0x43   : > { %340 = vmatpush.msra.mxu0 %v320_v8  ;;  %v308_v24 = vld [vmem:[#allocation5 + $0x50] sm:$0xff]  ;;  %v309_v25 = vld [vmem:[#allocation5 + $0x58] sm:$0xff]  ;;  %456 = vmatpush.msra.mxu3 %v425_v21  ;;  %v306_v28 = vld [vmem:[#allocation5 + $0x40] sm:$0xff] }
  0x44   : > { %366 = vmatpush.msra.mxu1 %v321_v9  ;;  %v307_v29 = vld [vmem:[#allocation5 + $0x48] sm:$0xff]  ;;  %431 = vmatpush.msra.mxu2 %v408_v22  ;;  %v304_v32 = vld [vmem:[#allocation5 + $0x30] sm:$0xff]  ;;  %v305_v33 = vld [vmem:[#allocation5 + $0x38] sm:$0xff]  ;;  %p844_p8 = pneg %p843_p4 }
  0x45   : > { %341 = vmatpush.msra.mxu0 %v318_v10  ;;  %457 = vmatpush.msra.mxu3 %v424_v23  ;;  %v406_v30 = vld [vmem:[#allocation8 + $0x60] sm:$0xff]  ;;  %v405_v34 = vld [vmem:[#allocation8 + $0x58] sm:$0xff]  ;;  %v404_v38 = vld [vmem:[#allocation8 + $0x50] sm:$0xff] }
  0x46   : > { %367 = vmatpush.msra.mxu1 %v319_v11  ;;  %v422_v31 = vld [vmem:[#allocation8 + $0xe0] sm:$0xff]  ;;  %432 = vmatpush.msra.mxu2 %v407_v26  ;;  %v421_v35 = vld [vmem:[#allocation8 + $0xd8] sm:$0xff]  ;;  %v420_v39 = vld [vmem:[#allocation8 + $0xd0] sm:$0xff]  ;;  %p849_p10 = pnand %p848_p2, %p844_p8 }
  0x47   : > { %342 = vmatpush.msra.mxu0 %v316_v12  ;;  %458 = vmatpush.msra.mxu3 %v423_v27  ;;  %v302_v36 = vld [vmem:[#allocation5 + $0x20] sm:$0xff]  ;;  %v303_v37 = vld [vmem:[#allocation5 + $0x28] sm:$0xff]  ;;  %v300_v40 = vld [vmem:[#allocation5 + $0x10] sm:$0xff] }
  0x48   : > { %368 = vmatpush.msra.mxu1 %v317_v13  ;;  %433 = vmatpush.msra.mxu2 %v406_v30  ;;  %v301_v41 = vld [vmem:[#allocation5 + $0x18] sm:$0xff]  ;;  %v403_v42 = vld [vmem:[#allocation8 + $0x48] sm:$0xff]  ;;  %v298_v44 = vld [vmem:[#allocation5] sm:$0xff] }
  0x49   : > { %343 = vmatpush.msra.mxu0 %v314_v14  ;;  %459 = vmatpush.msra.mxu3 %v422_v31  ;;  %v419_v43 = vld [vmem:[#allocation8 + $0xc8] sm:$0xff]  ;;  %v402_v47 = vld [vmem:[#allocation8 + $0x40] sm:$0xff]  ;;  %v401_v49 = vld [vmem:[#allocation8 + $0x38] sm:$0xff] }
  0x4a   : > { %369 = vmatpush.msra.mxu1 %v315_v15  ;;  %434 = vmatpush.msra.mxu2 %v405_v34  ;;  %v299_v45 = vld [vmem:[#allocation5 + $0x8] sm:$0xff]  ;;  %v417_v50 = vld [vmem:[#allocation8 + $0xb8] sm:$0xff]  ;;  %v400_v51 = vld [vmem:[#allocation8 + $0x30] sm:$0xff] }
  0x4b   : > { %344 = vmatpush.msra.mxu0 %v312_v16  ;;  %460 = vmatpush.msra.mxu3 %v421_v35  ;;  %v295_v46 = vld [vmem:[%s1061_s28] sm:$0xff]  ;;  %v296_v55 = vld [vmem:[%s1061_s28 + $0x8] sm:$0xff]  ;;  %v297_v59 = vld [vmem:[%s1061_s28 + $0x10] sm:$0xff] }
  0x4c   : > { %370 = vmatpush.msra.mxu1 %v313_v17  ;;  %435 = vmatpush.msra.mxu2 %v404_v38  ;;  %v418_v48 = vld [vmem:[#allocation8 + $0xc0] sm:$0xff]  ;;  %v416_v52 = vld [vmem:[#allocation8 + $0xb0] sm:$0xff]  ;;  %v399_v53 = vld [vmem:[#allocation8 + $0x28] sm:$0xff] }
  0x4d   : > { %345 = vmatpush.msra.mxu0 %v310_v18  ;;  %461 = vmatpush.msra.mxu3 %v420_v39  ;;  %v415_v54 = vld [vmem:[#allocation8 + $0xa8] sm:$0xff]  ;;  %v398_v56 = vld [vmem:[#allocation8 + $0x20] sm:$0xff]  ;;  %v397_v58 = vld [vmem:[#allocation8 + $0x18] sm:$0xff] }
  0x4e   : > { %371 = vmatpush.msra.mxu1 %v311_v19  ;;  %436 = vmatpush.msra.mxu2 %v403_v42  ;;  %v414_v57 = vld [vmem:[#allocation8 + $0xa0] sm:$0xff]  ;;  %v396_v60 = vld [vmem:[#allocation8 + $0x10] sm:$0xff]  ;;  %v413_v61 = vld [vmem:[#allocation8 + $0x98] sm:$0xff] }
  0x4f   : > { %346 = vmatpush.msra.mxu0 %v308_v24  ;;  %462 = vmatpush.msra.mxu3 %v419_v43  ;;  %v395_v62 = vld [vmem:[#allocation8 + $0x8] sm:$0xff]  ;;  %v412_v63 = vld [vmem:[#allocation8 + $0x90] sm:$0xff]  ;;  %v394_v0 = vld [vmem:[#allocation8] sm:$0xff] }
  0x50   : > { %372 = vmatpush.msra.mxu1 %v309_v25  ;;  %437 = vmatpush.msra.mxu2 %v402_v47  ;;  %v411_v1 = vld [vmem:[#allocation8 + $0x88] sm:$0xff]  ;;  %v410_v2 = vld [vmem:[#allocation8 + $0x80] sm:$0xff]  ;;  %v330_v3 = vld [vmem:[#allocation7] sm:$0x3] }
  0x51   : > { %347 = vmatpush.msra.mxu0 %v306_v28  ;;  %463 = vmatpush.msra.mxu3 %v418_v48  ;;  %v332_v4 = vperm.slane %v330_v3, 0  ;;  %v333_v5 = vperm.slane %v330_v3, 1  ;;  %v704_v24 = vld [vmem:[%s1120_s4] ss:$0 sm:$0xff] }
  0x52   : > { %373 = vmatpush.msra.mxu1 %v307_v29  ;;  %438 = vmatpush.msra.mxu2 %v401_v49 }
  0x53   : > { %348 = vmatpush.msra.mxu0 %v304_v32  ;;  %464 = vmatpush.msra.mxu3 %v417_v50 }
  0x54   : > { %374 = vmatpush.msra.mxu1 %v305_v33  ;;  %439 = vmatpush.msra.mxu2 %v400_v51 }
  0x55   : > { %349 = vmatpush.msra.mxu0 %v302_v36  ;;  %465 = vmatpush.msra.mxu3 %v416_v52 }
  0x56   : > { %375 = vmatpush.msra.mxu1 %v303_v37  ;;  %440 = vmatpush.msra.mxu2 %v399_v53 }
  0x57   : > { %350 = vmatpush.msra.mxu0 %v300_v40  ;;  %466 = vmatpush.msra.mxu3 %v415_v54 }
  0x58   : > { %376 = vmatpush.msra.mxu1 %v301_v41  ;;  %441 = vmatpush.msra.mxu2 %v398_v56 }
  0x59   : > { %351 = vmatpush.msra.mxu0 %v298_v44  ;;  %467 = vmatpush.msra.mxu3 %v414_v57 }
  0x5a   : > { %377 = vmatpush.msra.mxu1 %v299_v45  ;;  %352 = vmatmul.f32.vlgmr.msra.gmra.mxu0 %v295_v46 }
  0x5b   : > { %378 = vmatmul.f32.vlgmr.msra.gmra.mxu1 %v295_v46  ;;  %442 = vmatpush.msra.mxu2 %v397_v58 }
  0x5c   : > { %468 = vmatpush.msra.mxu3 %v413_v61 }
  0x5d   : > { %443 = vmatpush.msra.mxu2 %v396_v60 }
  0x5e   : > { %469 = vmatpush.msra.mxu3 %v412_v63 }
  0x5f   : > { %444 = vmatpush.msra.mxu2 %v395_v62 }
  0x60   : > { %470 = vmatpush.msra.mxu3 %v411_v1 }
  0x61   : > { %445 = vmatpush.msra.mxu2 %v394_v0 }
  0x62   : > { %355 = vmatmul.f32.gmra.mxu0 %v296_v55  ;;  %471 = vmatpush.msra.mxu3 %v410_v2 }
  0x63   : > { %381 = vmatmul.f32.gmra.mxu1 %v296_v55 }
  0x6a   : > { %358 = vmatmul.f32.gmra.mxu0 %v297_v59 }
  0x6b   : > { %384 = vmatmul.f32.gmra.mxu1 %v297_v59 }
  0xd7   : > { %v353_v6 = vpop.f32.mrf.mxu0 }
  0xd8   : > { %v379_v7 = vpop.f32.mrf.mxu1  ;;  %v354_v8 = vadd.f32 %v353_v6, %v332_v4 }
  0xd9   : > { %v380_v9 = vadd.f32 %v379_v7, %v333_v5 }
  0xda   : > { %v388_v10 = vmax.f32 %v354_v8, 0.0 }
  0xdb   : > { %v389_v11 = vmax.f32 %v380_v9, 0.0 }
  0xdc   : > { %446 = vmatmul.f32.vlgmr.msra.gmra.mxu2 %v388_v10 }
  0xdd   : > { %472 = vmatmul.f32.vlgmr.msra.gmra.mxu3 %v389_v11 }
  0xdf   : > { %v356_v12 = vpop.f32.mrf.mxu0 }
  0xe0   : > { %v382_v13 = vpop.f32.mrf.mxu1  ;;  %v357_v14 = vadd.f32 %v356_v12, %v332_v4 }
  0xe1   : > { %v383_v15 = vadd.f32 %v382_v13, %v333_v5 }
  0xe2   : > { %v390_v16 = vmax.f32 %v357_v14, 0.0 }
  0xe3   : > { %v391_v17 = vmax.f32 %v383_v15, 0.0 }
  0xe4   : > { %449 = vmatmul.f32.gmra.mxu2 %v390_v16 }
  0xe5   : > { %475 = vmatmul.f32.gmra.mxu3 %v391_v17 }
  0xe7   : > { %v359_v18 = vpop.f32.mrf.mxu0 }
  0xe8   : > { %v385_v19 = vpop.f32.mrf.mxu1  ;;  %v360_v20 = vadd.f32 %v359_v18, %v332_v4 }
  0xe9   : > { %v386_v21 = vadd.f32 %v385_v19, %v333_v5 }
  0xea   : > { %v392_v22 = vmax.f32 %v360_v20, 0.0 }
  0xeb   : > { %v393_v23 = vmax.f32 %v386_v21, 0.0 }
  0xec   : > { %452 = vmatmul.f32.gmra.mxu2 %v392_v22 }
  0xed   : > { %478 = vmatmul.f32.gmra.mxu3 %v393_v23 }
 0x15f   : > { %v447_v25 = vpop.f32.mrf.mxu2 }
 0x160   : > { %v473_v26 = vpop.f32.mrf.mxu3  ;;  %v448_v27 = vadd.f32 %v704_v24, %v447_v25 }
 0x162   : > { %v474_v28 = vadd.f32 %v473_v26, %v448_v27 }
 0x164   : > { %482 = vst [vmem:[%s292_s16] sm:$0xff] %v474_v28 }
 0x167   : > { %v450_v29 = vpop.f32.mrf.mxu2 }
 0x168   : > { %v476_v30 = vpop.f32.mrf.mxu3  ;;  %v451_v31 = vadd.f32 %v704_v24, %v450_v29 }
 0x16a   : > { %v477_v32 = vadd.f32 %v476_v30, %v451_v31 }
 0x16c   : > { %483 = vst [vmem:[%s292_s16 + $0x8] sm:$0xff] %v477_v32 }
 0x16f   : > { %v453_v33 = vpop.f32.mrf.mxu2 }
 0x170   : > { %v479_v34 = vpop.f32.mrf.mxu3  ;;  %v454_v35 = vadd.f32 %v704_v24, %v453_v33 }
 0x172   : > { %v480_v36 = vadd.f32 %v479_v34, %v454_v35 }
 0x174   : > { %484 = vst [vmem:[%s292_s16 + $0x10] sm:$0xff] %v480_v36 }
 0x175   : > { %852 = shalt.err (!%p849_p10)
}
 0x176   : > { %s908_s15 = smov 128   ;;  %s909_s24 = smov 8  }
 0x177   : > { %635 = dma.vmem_to_hbm [thread:$0]  (%p1026_p7), %s499_s8, 384, %s501_s11, %s486_s13, %s908_s15, %s908_s15, %s909_s24  }
 0x178 PF: > { %s515_s29 = sand.u32 1, %s887_s18   ;;  %p1134_p12 = scmp.ge.s32.totalorder %s899_s21, 2 }
 0x179   : > { %s516_s16 = scalar_lea.sflag [#allocation4], %s515_s29 }
 0x17a   : > { %p652_p13 = pnand %p1134_p12, %p975_p6 }
 0x17c   : > { %p653_p0 = pneg %p652_p13 }
 0x17e   : > { %882 = dma.done.wait (%p653_p0), %s516_s16, 384  }
 0x17f   : > { %884 = vsyncadd (%p653_p0), %s516_s16, 4294966912  ;;  %p20_p3 = scmp.ge.s32.totalorder %s1012_s30, 4   ;;  %s1135_s18 = smov %s891_s19 }
 0x180   : > { %s1136_s19 = smov %s895_s20  ;;  %s1137_s20 = smov %s1022_s9 }
 0x181   : > { %s1138_s21 = smov %s1012_s30  ;;  %22 = sbr.rel (!%p20_p3) target bundleno = 9 (0x9), region = 97 }
 0x186   :  { %522 = vsyncpa [#allocation3], 1 }
 0x187   :  { %524 = vsyncpa [#allocation3 + $0x1], 1 }
 0x188   :  { %525 = vsyncpa [#allocation6], 1 }
 0x189   :  { %526 = vsyncpa [#allocation9], 1 }
 0x18a   :  { %527 = vsyncpa [#allocation4], 1 }
 0x18b   :  { %529 = vsyncpa [#allocation4 + $0x1], 1 }

</bundles_post_ra>
